<compile_context>
chip_gen: v7x
topology: tpu7x:2x2x1
jax: 0.10.0
libtpu: 0.0.40
codegen_flags: <defaults>
</compile_context>

<pallas_src>
import jax
import jax.numpy as jnp
from jax.experimental import pallas as pl
from jax.experimental.pallas import tpu as pltpu

_LANES = 128
_SUBLANES = 8
_DEFAULT_BLOCK_ROWS = 2048  # 2048 * 128 * 4B = 1 MiB per f32 block


def _brightness_kernel(factor_ref, img_ref, out_ref):
    # factor_ref: SMEM (N,) per-image brightness factors
    # img_ref / out_ref: VMEM tile (1, block_rows, 128) of the flattened image
    f = factor_ref[pl.program_id(0)]
    out_ref[...] = jnp.clip(img_ref[...] * f, 0.0, 1.0)


def brightness_pallas(image, factors, *, block_rows=_DEFAULT_BLOCK_ROWS):
    """image: (N, C, H, W) float32, factors: (N,) float32."""
    N, C, H, W = image.shape
    total = C * H * W

    # Lane-dense layout: flatten each image, pad to a whole number of
    # (sublane, lane)-aligned rows, then view as (N, rows_padded, 128).
    rows = -(-total // _LANES)                           # ceil
    rows_pad8 = -(-rows // _SUBLANES) * _SUBLANES        # >= 8, multiple of 8
    br = min(block_rows, rows_pad8)                      # rows per block
    rows_padded = -(-rows_pad8 // br) * br               # grid divides evenly
    padded_total = rows_padded * _LANES
    num_chunks = rows_padded // br

    flat = image.reshape(N, total)
    if padded_total != total:
        flat = jnp.pad(flat, ((0, 0), (0, padded_total - total)))
    flat = flat.reshape(N, rows_padded, _LANES)

    out_flat = pl.pallas_call(
        _brightness_kernel,
        out_shape=jax.ShapeDtypeStruct((N, rows_padded, _LANES), image.dtype),
        grid=(N, num_chunks),
        in_specs=[
            pl.BlockSpec(memory_space=pltpu.SMEM),                  # factors (whole)
            pl.BlockSpec((1, br, _LANES), lambda i, j: (i, j, 0)),  # image chunk
        ],
        out_specs=pl.BlockSpec((1, br, _LANES), lambda i, j: (i, j, 0)),
        compiler_params=pltpu.CompilerParams(
            dimension_semantics=("parallel", "parallel"),
            vmem_limit_bytes=32 * 1024 * 1024,
        ),
    )(factors, flat)

    out = out_flat.reshape(N, padded_total)[:, :total].reshape(N, C, H, W)
    return out


class Brightness:
    """JAX/Pallas equivalent of the PyTorch Brightness module."""

    def __init__(self, brightness=0.5, p=1.0, key=jax.random.PRNGKey(0)):
        self.brightness = brightness
        self.p = p  # p=1 -> always applied (no per-sample bernoulli gate needed)
        self.key = key

    def __call__(self, image_cover_mask):
        image = image_cover_mask[0]
        n = image.shape[0]
        # Per-image brightness factor ~ U(1 - b, 1 + b), deterministic via PRNGKey.
        factors = jax.random.uniform(
            self.key, (n,), dtype=jnp.float32,
            minval=1.0 - self.brightness, maxval=1.0 + self.brightness,
        )
        return brightness_pallas(image, factors)


if __name__ == "__main__":
    key = jax.random.PRNGKey(0)
    k_img, k_factor, k_img2 = jax.random.split(key, 3)

    # --- main test: shapes consistent with the module ---
    N, C, H, W = 2, 4, 16, 16
    image = jax.random.uniform(k_img, (N, C, H, W), dtype=jnp.float32)  # in [0, 1]
    cover = jnp.zeros((N, C, H, W), dtype=jnp.float32)
    mask = jnp.zeros((N, 1, H, W), dtype=jnp.float32)

    module = Brightness(brightness=0.5, p=1, key=k_factor)
    out = module((image, cover, mask))
    out = jax.block_until_ready(out)

    factors = jax.random.uniform(k_factor, (N,), dtype=jnp.float32,
                                 minval=0.5, maxval=1.5)
    ref = jnp.clip(image * factors[:, None, None, None], 0.0, 1.0)
    assert out.shape == (N, C, H, W)
    assert jnp.allclose(out, ref, atol=1e-6)

    # --- second test: non-128-aligned flattened size exercises the pad/slice path ---
    N2, C2, H2, W2 = 2, 3, 17, 19
    image2 = jax.random.uniform(k_img2, (N2, C2, H2, W2), dtype=jnp.float32)
    out2 = jax.block_until_ready(brightness_pallas(image2, factors))
    ref2 = jnp.clip(image2 * factors[:, None, None, None], 0.0, 1.0)
    assert out2.shape == (N2, C2, H2, W2)
    assert jnp.allclose(out2, ref2, atol=1e-6)

    print("KERNEL_OK")
</pallas_src>

<mosaic_0001>
module attributes {stable_mosaic.version = 11 : i64} {
  func.func @_brightness_kernel(%arg0: i32, %arg1: i32, %arg2: memref<2xf32, #tpu.memory_space<smem>>, %arg3: memref<1x8x128xf32, #tpu.memory_space<vmem>>, %arg4: memref<1x8x128xf32, #tpu.memory_space<vmem>>) attributes {dimension_semantics = [#tpu.dimension_semantics<parallel>, #tpu.dimension_semantics<parallel>], iteration_bounds = array<i64: 2, 1>, scalar_prefetch = 0 : i64, scratch_operands = 0 : i64, tpu.core_type = #tpu.core_type<tc>, window_params = [{transform_indices = @transform_0, window_bounds = array<i64: 2>}, {transform_indices = @transform_1, window_bounds = array<i64: 1, 8, 128>}, {transform_indices = @transform_2, window_bounds = array<i64: 1, 8, 128>}]} {
    %0 = arith.index_cast %arg0 : i32 to index
    %1 = memref.load %arg2[%0] : memref<2xf32, #tpu.memory_space<smem>>
    %c0 = arith.constant 0 : index
    %c0_0 = arith.constant 0 : index
    %c0_1 = arith.constant 0 : index
    %2 = vector.load %arg3[%c0, %c0_0, %c0_1] : memref<1x8x128xf32, #tpu.memory_space<vmem>>, vector<1x8x128xf32>
    %3 = vector.broadcast %1 : f32 to vector<1x8x128xf32>
    %4 = arith.mulf %2, %3 : vector<1x8x128xf32>
    %cst = arith.constant 0.000000e+00 : f32
    %cst_2 = arith.constant 1.000000e+00 : f32
    %5 = vector.broadcast %cst : f32 to vector<1x8x128xf32>
    %6 = arith.maximumf %5, %4 : vector<1x8x128xf32>
    %7 = vector.broadcast %cst_2 : f32 to vector<1x8x128xf32>
    %8 = arith.minimumf %7, %6 : vector<1x8x128xf32>
    %c0_3 = arith.constant 0 : index
    %c0_4 = arith.constant 0 : index
    %c0_5 = arith.constant 0 : index
    %9 = vector.load %arg4[%c0_3, %c0_4, %c0_5] : memref<1x8x128xf32, #tpu.memory_space<vmem>>, vector<1x8x128xf32>
    tpu.vector_store %arg4[%c0_3, %c0_4, %c0_5], %8 {strides = array<i32>} : memref<1x8x128xf32, #tpu.memory_space<vmem>>, vector<1x8x128xf32>,
    return
  }
  func.func @transform_0(%arg0: i32, %arg1: i32) -> i32 {
    %c0_i32 = arith.constant 0 : i32
    %c0_i32_0 = arith.constant 0 : i32
    return %c0_i32 : i32
  }
  func.func @transform_1(%arg0: i32, %arg1: i32) -> (i32, i32, i32) {
    %c0_i32 = arith.constant 0 : i32
    %c0_i32_0 = arith.constant 0 : i32
    return %arg0, %arg1, %c0_i32 : i32, i32, i32
  }
  func.func @transform_2(%arg0: i32, %arg1: i32) -> (i32, i32, i32) {
    %c0_i32 = arith.constant 0 : i32
    %c0_i32_0 = arith.constant 0 : i32
    return %arg0, %arg1, %c0_i32 : i32, i32, i32
  }
}

</mosaic_0001>

<bundles_post_ra>
// kernel: tpu_custom_call.1
= control target key start
LH: loop header
LB: loop body
LE: loop exit
PB: predicated region body
PF: predicated region fallthrough
CT: control target
= control target key end

     0   :  { %7 = vsyncpa [#allocation5], 0  ;;  %s766_s0 = inlined_call_operand.hbm [shape: f32[2], index: 0, kind: input, shape index: {}]   ;;  %s767_s1 = inlined_call_operand.hbm [shape: f32[2,8,128], index: 1, kind: input, shape index: {}]   ;;  %s768_s2 = inlined_call_operand.hbm [shape: f32[2,8,128], index: 2, kind: output, shape index: {}]  }
   0x1   :  { %8 = vsyncpa [#allocation3], 0 }
   0x2   :  { %10 = vsyncpa [#allocation3 + $0x1], 0 }
   0x3   :  { %11 = vsyncpa [#allocation4], 0 }
   0x4   :  { %13 = vsyncpa [#allocation4 + $0x1], 0  ;;  %s539_s9 = smov 0   ;;  %s541_s10 = smov 0  }
   0x5   :  { %s543_s11 = smov 0   ;;  %s545_s12 = smov 0  }
   0x6   :  { %s547_s13 = smov 0   ;;  %s549_s14 = smov 0  }
   0x7 LB: > { %s302_s15 = sadd.s32 4294967295, %s519_s14   ;;  %s303_s16 = sadd.s32 4294967294, %s519_s14   ;;  %s519_s14 = sphi %s549_s14, %s19_s14   ;;  %s515_s13 = sphi %s547_s13, %s792_s13   ;;  %s511_s12 = sphi %s545_s12, %s791_s12   ;;  %s507_s11 = sphi %s543_s11, %s790_s11   ;;  %s503_s10 = sphi %s541_s10, %s789_s10   ;;  %s499_s9 = sphi %s539_s9, %s788_s9  }
   0x8   : > { %p74_p0 = scmp.ne.s32.totalorder %s503_s10, %s499_s9  ;;  %p573_p1 = scmp.eq.s32.totalorder %s302_s15, 0 }
   0x9   : > { %p577_p2 = scmp.eq.s32.totalorder %s302_s15, 1  ;;  %p106_p3 = scmp.eq.s32.totalorder %s303_s16, 1 }
   0xa   : > { %s773_s17 = scalar_select %p573_p1, 1, 0 }
   0xb   : > { %p583_p4 = por %p573_p1, %p74_p0  ;;  %p304_p5 = scmp.ge.s32.totalorder %s519_s14, 1 }
   0xc   : > { %p588_p6 = por %p106_p3, %p74_p0  ;;  %p113_p7 = scmp.lt.s32.totalorder %s519_s14, 3 }
   0xd   : > { %s775_s19 = scalar_select %p583_p4, 1, 0 }
   0xe   : > { %s776_s20 = scalar_select %p588_p6, 1, 0 }
   0xf   : > { %p593_p8 = pnand %p304_p5, %p113_p7  ;;  %s31_s22 = sadd.s32 1, %s515_s13 }
  0x10   : > { %p607_p12 = scmp.ge.s32.totalorder %s31_s22, 2  ;;  %s61_s25 = sadd.s32 1, %s507_s11 }
  0x11   : > { %p325_p10 = pneg %p593_p8  ;;  %p68_p13 = scmp.ne.s32.totalorder %s507_s11, %s503_s10 }
  0x12   : > { %p69_p0 = scmp.eq.s32.totalorder %s519_s14, 0  ;;  %s390_s28 = scalar_lea.hbm %s766_s0, 16 }
  0x13   : > { %p603_p11 = pnand %p325_p10, %p573_p1  ;;  %p391_p3 = scmp.ne.s32.totalorder %s766_s0, %s390_s28 }
  0x14   : > { %p397_p9 = scmp.lt.u32.totalorder %s390_s28, %s766_s0 }
  0x15   : > { %p392_p5 = pneg %p603_p11 }
  0x17   : > { %p393_p7 = pnand %p392_p5, %p391_p3 }
  0x19   : > { %p394_p10 = pneg %p393_p7 }
  0x1b   : > { %p399_p6 = pnand %p397_p9, %p394_p10 }
  0x1d   : > { %402 = shalt.err (!%p399_p6)
}
  0x1e   : > { %s521_s5 = smov [#allocation2]   ;;  %s794_s22 = smov (%p607_p12, %s31_s22), 0 }
  0x1f   : > { %328 = dma.hbm_to_smem (!%p603_p11), %s766_s0, 16, %s521_s5, [#allocation5]  }
  0x20   : > { %p638_p6 = por %p69_p0, %p68_p13  ;;  %p647_p9 = por %p577_p2, %p68_p13 }
  0x21   : > { %s56_s16 = ssub.s32 %s515_s13, %s794_s22  ;;  %p338_p3 = scmp.lt.s32.totalorder %s519_s14, 2 }
  0x22   : > { %s781_s15 = scalar_select %p647_p9, 1, 0 }
  0x23   : > { %p59_p5 = scmp.eq.s32.totalorder %s56_s16, 0  ;;  %s135_s23 = sand.u32 1, %s507_s11  }
  0x24   : > { %s307_s24 = sshll.u32 %s135_s23, 3  ;;  %s308_s27 = sshll.u32 %s515_s13, 7 }
  0x25   : > { %s656_s26 = scalar_select %p59_p5, %s507_s11, %s61_s25  }
  0x26   : > { %s662_s30 = scalar_lea.hbm %s767_s1, %s308_s27  ;;  %s139_s18 = scalar_lea.vmem [#allocation6], %s307_s24 }
  0x27   : > { %s147_s3 = sshll.u32 %s139_s18, 4  ;;  %p668_p2 = pnand %p338_p3, %p638_p6  ;;  %s664_s3 = int_to_ptr.vmem [resolvable:$true] %s147_s3 }
  0x28   : > { %s136_s25 = scalar_lea.sflag [#allocation3], %s135_s23  ;;  %s403_s5 = scalar_lea.hbm %s662_s30, 128 }
  0x29   : > { %p404_p11 = scmp.ne.s32.totalorder %s662_s30, %s403_s5  ;;  %p405_p12 = pneg %p668_p2 }
  0x2a   : > { %s408_s16 = scalar_lea.hbm %s767_s1, 256  ;;  %p409_p7 = scmp.lt.u32.totalorder %s662_s30, %s767_s1 }
  0x2b   : > { %p406_p13 = pnand %p405_p12, %p404_p11  ;;  %p410_p10 = scmp.lt.u32.totalorder %s408_s16, %s403_s5 }
  0x2c   : > { %p412_p3 = scmp.lt.u32.totalorder %s403_s5, %s662_s30 }
  0x2d   : > { %p407_p0 = pneg %p406_p13  ;;  %p411_p6 = por %p410_p10, %p409_p7 }
  0x2f   : > { %p413_p5 = por %p412_p3, %p411_p6 }
  0x31   : > { %p414_p9 = pnand %p413_p5, %p407_p0 }
  0x33   : > { %417 = shalt.err (!%p414_p9)
}
  0x34   : > { %s418_s23 = scalar_lea.vmem %s664_s3, 128  ;;  %s522_s27 = smov [#allocation6]  }
  0x35   : > { %p419_p11 = scmp.ne.s32.totalorder %s664_s3, %s418_s23  ;;  %s423_s28 = sshll.u32 %s522_s27, 4  ;;  %s424_s28 = int_to_ptr.vmem [resolvable:$false] %s423_s28 }
  0x36   : > { %s425_s29 = scalar_lea.vmem %s424_s28, 256  ;;  %p426_p1 = scmp.lt.s32.totalorder %s664_s3, %s424_s28 }
  0x37   : > { %p421_p13 = pnand %p419_p11, %p405_p12  ;;  %p427_p7 = scmp.lt.s32.totalorder %s425_s29, %s418_s23 }
  0x39   : > { %p422_p4 = pneg %p421_p13  ;;  %p428_p10 = por %p427_p7, %p426_p1 }
  0x3b   : > { %p429_p6 = pnand %p428_p10, %p422_p4 }
  0x3d   : > { %432 = shalt.err (!%p429_p6)
}
  0x3e   : > { %332 = dma.hbm_to_vmem [thread:$0]  (!%p668_p2), %s662_s30, 128, %s664_s3, %s136_s25  }
  0x3f   : > { %156 = sbr.rel (%p593_p8) target bundleno = 104 (0x68), region = 28  ;;  %p783_p9 = scmp.ne.s32.totalorder (!%p593_p8), %s773_s17, 0 }
  0x46   : > { %486 = dma.done.wait (%p783_p9), [#allocation5], 16  }
  0x47   : > { %488 = vsyncadd (%p783_p9), [#allocation5], 4294967280  ;;  %s704_s18 = sand.u32 1, %s503_s10   ;;  %p784_p1 = scmp.ne.s32.totalorder %s775_s19, 0 }
  0x48   : > { %s311_s5 = sshll.u32 %s704_s18, 3  ;;  %s163_s4 = scalar_lea.sflag [#allocation3], %s704_s18 }
  0x49   : > { %s166_s6 = scalar_lea.vmem [#allocation6], %s311_s5 }
  0x4a   : > { %490 = dma.done.wait (%p784_p1), %s163_s4, 128  }
  0x4b   : > { %492 = vsyncadd (%p784_p1), %s163_s4, 4294967168 }
  0x4c   : > { %171 = sfence }
  0x4d   : > { %s188_s17 = sld [smem:[#allocation2 + %s511_s12]]  ;;  %v189_v0 = vld [vmem:[%s166_s6] sm:$0xff]  ;;  %s187_s21 = scalar_lea.vmem [#allocation7], %s311_s5 }
  0x4e   : > { %s210_s30 = sshll.u32 %s187_s21, 4  ;;  %s314_s3 = sshll.u32 %s511_s12, 7  ;;  %s714_s30 = int_to_ptr.vmem [resolvable:$true] %s210_s30 }
  0x4f   : > { %s719_s19 = scalar_lea.hbm %s768_s2, %s314_s3  ;;  %s196_s16 = scalar_lea.sflag [#allocation4], %s704_s18 }
  0x50   : > { %s433_s8 = scalar_lea.vmem %s714_s30, 128  ;;  %p785_p8 = scmp.ne.s32.totalorder %s781_s15, 0 }
  0x51   : > { %p434_p4 = scmp.ne.s32.totalorder %s714_s30, %s433_s8  ;;  %s523_s12 = smov [#allocation7]  }
  0x52   : > { %s437_s24 = sshll.u32 %s523_s12, 4  ;;  %s438_s24 = int_to_ptr.vmem [resolvable:$false] %s437_s24 }
  0x53   : > { %v190_v1 = vstv %s188_s17  ;;  %p435_p2 = pnand %p434_p4, %p785_p8  ;;  %s439_s23 = scalar_lea.vmem %s438_s24, 256 }
  0x54   : > { %v191_v2 = vmul.f32 %v190_v1, %v189_v0  ;;  %p440_p0 = scmp.lt.s32.totalorder %s714_s30, %s438_s24  ;;  %p441_p3 = scmp.lt.s32.totalorder %s439_s23, %s433_s8 }
  0x55   : > { %p436_p12 = pneg %p435_p2 }
  0x56   : > { %v192_v3 = vmax.f32 %v191_v2, 0.0  ;;  %p442_p5 = por %p441_p3, %p440_p0 }
  0x58   : > { %v193_v4 = vmin.f32 %v192_v3, 1.0  ;;  %p443_p11 = pnand %p442_p5, %p436_p12 }
  0x5a   : > { %194 = vst [vmem:[%s187_s21] sm:$0xff] %v193_v4 }
  0x5b   : > { %446 = shalt.err (!%p443_p11)
}
  0x5c   : > { %s447_s27 = scalar_lea.hbm %s719_s19, 128  ;;  %s451_s18 = scalar_lea.hbm %s768_s2, 256 }
  0x5d   : > { %p448_p13 = scmp.ne.s32.totalorder %s719_s19, %s447_s27  ;;  %p452_p6 = scmp.lt.u32.totalorder %s719_s19, %s768_s2 }
  0x5e   : > { %p453_p9 = scmp.lt.u32.totalorder %s451_s18, %s447_s27  ;;  %p455_p4 = scmp.lt.u32.totalorder %s447_s27, %s719_s19 }
  0x5f   : > { %p449_p7 = pnand %p448_p13, %p785_p8 }
  0x60   : > { %p454_p1 = por %p453_p9, %p452_p6 }
  0x61   : > { %p450_p10 = pneg %p449_p7 }
  0x62   : > { %p456_p2 = por %p455_p4, %p454_p1 }
  0x64   : > { %p457_p12 = pnand %p456_p2, %p450_p10 }
  0x66   : > { %460 = shalt.err (!%p457_p12)
}
  0x67   : > { %323 = dma.vmem_to_hbm [thread:$0]  (%p785_p8), %s714_s30, 128, %s719_s19, %s196_s16  }
  0x68 PF: > { %s222_s6 = sand.u32 1, %s499_s9   ;;  %p786_p0 = scmp.ne.s32.totalorder %s776_s20, 0 }
  0x69   : > { %p787_p3 = scmp.ge.s32.totalorder %s519_s14, 2  ;;  %s223_s17 = scalar_lea.sflag [#allocation4], %s222_s6 }
  0x6b   : > { %p334_p5 = pnand %p787_p3, %p786_p0 }
  0x6d   : > { %494 = dma.done.wait (!%p334_p5), %s223_s17, 128  }
  0x6e   : > { %496 = vsyncadd (!%p334_p5), %s223_s17, 4294967168  ;;  %s19_s14 = sadd.s32 1, %s519_s14   ;;  %s788_s9 = smov %s503_s10 }
  0x6f   : > { %p16_p11 = scmp.ge.s32.totalorder %s19_s14, 4   ;;  %s789_s10 = smov %s507_s11 }
  0x70   : > { %s790_s11 = smov %s656_s26  ;;  %s791_s12 = smov %s515_s13 }
  0x71   : > { %s792_s13 = smov %s794_s22  ;;  %18 = sbr.rel (!%p16_p11) target bundleno = 7 (0x7), region = 78 }
  0x78   :  { %228 = vsyncpa [#allocation3], 1 }
  0x79   :  { %230 = vsyncpa [#allocation3 + $0x1], 1 }
  0x7a   :  { %231 = vsyncpa [#allocation4], 1 }
  0x7b   :  { %233 = vsyncpa [#allocation4 + $0x1], 1 }
  0x7c   :  { %234 = vsyncpa [#allocation5], 1 }
  0x7d   :  { %236 = vsyncpa [#allocation5 + $0x1], 1 }

</bundles_post_ra>
